<compile_context>
chip_gen: v5e
topology: v5e:2x2
jax: 0.10.0
libtpu: 0.0.40
codegen_flags: <defaults>
</compile_context>

<pallas_src>
import jax
import jax.numpy as jnp
from jax.experimental import pallas as pl
from jax.experimental.pallas import tpu as pltpu

_LANE = 128


def _identity_kernel(x_ref, o_ref):
    # Pure pass-through: copy the current VMEM tile to the (aliased) output.
    o_ref[...] = x_ref[...]


@jax.jit
def dummy_forward(x: jax.Array) -> jax.Array:
    """Pallas implementation of Dummy.forward(input) -> input (identity)."""
    orig_shape = x.shape
    orig_dtype = x.dtype
    total = int(x.size)

    if total == 0:
        # Nothing to move; identity of an empty tensor.
        return x

    # ------------------------------------------------------------------
    # Lane-dense layout: flatten everything and pick a wide column count
    # that is a multiple of 128 (the vreg lane width).
    # ------------------------------------------------------------------
    flat = x.reshape(-1)

    cols = None
    for cand in (4096, 2048, 1024, 512, 256, 128):
        if total % cand == 0:
            cols = cand
            break

    pad = 0
    if cols is None:
        # Handle the ragged tail in the wrapper (static pad), keep the kernel
        # itself lane-dense and unmasked.
        cols = _LANE
        pad = (-total) % cols
        flat = jnp.pad(flat, (0, pad))

    padded_total = total + pad
    rows = padded_total // cols

    # ------------------------------------------------------------------
    # Tile size: target ~2 MiB per block. With double buffering on both the
    # input and the output this is ~8 MiB of VMEM — safe on every generation
    # (v5e 16 MiB default scoped, v6e/v7x 32 MiB).
    # ------------------------------------------------------------------
    bytes_per_elem = jnp.dtype(orig_dtype).itemsize
    target_block_bytes = 2 * 1024 * 1024
    tile_r = max(8, target_block_bytes // (cols * bytes_per_elem))
    tile_r = max(8, (tile_r // 8) * 8)  # sublane-aligned
    if tile_r > rows:
        tile_r = rows  # full-extent block along rows (always legal)

    grid = (pl.cdiv(rows, tile_r),)

    x2d = flat.reshape(rows, cols)

    out2d = pl.pallas_call(
        _identity_kernel,
        out_shape=jax.ShapeDtypeStruct((rows, cols), orig_dtype),
        grid_spec=pltpu.PrefetchScalarGridSpec(
            num_scalar_prefetch=0,
            grid=grid,
            in_specs=[pl.BlockSpec((tile_r, cols), lambda i: (i, 0))],
            out_specs=pl.BlockSpec((tile_r, cols), lambda i: (i, 0)),
        ),
        compiler_params=pltpu.CompilerParams(
            dimension_semantics=("parallel",),
        ),
        # Output aliases the input buffer -> no extra HBM allocation and XLA
        # can elide the round-trip when the input is donatable.
        input_output_aliases={0: 0},
    )(x2d)

    out_flat = out2d.reshape(-1)
    if pad:
        out_flat = out_flat[:total]
    return out_flat.reshape(orig_shape)


if __name__ == "__main__":
    key = jax.random.PRNGKey(0)
    # Small NCHW input consistent with a conv-style module: (N, C, H, W)
    x = jax.random.normal(key, (2, 4, 16, 16), dtype=jnp.float32)

    y = dummy_forward(x)
    y = jax.block_until_ready(y)

    # Verify identity semantics exactly.
    assert y.shape == x.shape and y.dtype == x.dtype
    assert bool(jnp.all(y == x))

    print("KERNEL_OK")
</pallas_src>

<mosaic_0001>
module attributes {stable_mosaic.version = 11 : i64} {
  func.func @_identity_kernel(%arg0: i32, %arg1: memref<1x2048xf32, #tpu.memory_space<vmem>>, %arg2: memref<1x2048xf32, #tpu.memory_space<vmem>>) attributes {dimension_semantics = [#tpu.dimension_semantics<parallel>], iteration_bounds = array<i64: 1>, scalar_prefetch = 0 : i64, scratch_operands = 0 : i64, tpu.core_type = #tpu.core_type<tc>, window_params = [{transform_indices = @transform_0, window_bounds = array<i64: 1, 2048>}, {transform_indices = @transform_1, window_bounds = array<i64: 1, 2048>}]} {
    %c0 = arith.constant 0 : index
    %c0_0 = arith.constant 0 : index
    %0 = vector.load %arg1[%c0, %c0_0] : memref<1x2048xf32, #tpu.memory_space<vmem>>, vector<1x2048xf32>
    %c0_1 = arith.constant 0 : index
    %c0_2 = arith.constant 0 : index
    %1 = vector.load %arg2[%c0_1, %c0_2] : memref<1x2048xf32, #tpu.memory_space<vmem>>, vector<1x2048xf32>
    tpu.vector_store %arg2[%c0_1, %c0_2], %0 {strides = array<i32>} : memref<1x2048xf32, #tpu.memory_space<vmem>>, vector<1x2048xf32>,
    return
  }
  func.func @transform_0(%arg0: i32) -> (i32, i32) {
    %c0_i32 = arith.constant 0 : i32
    %c0_i32_0 = arith.constant 0 : i32
    return %arg0, %c0_i32 : i32, i32
  }
  func.func @transform_1(%arg0: i32) -> (i32, i32) {
    %c0_i32 = arith.constant 0 : i32
    %c0_i32_0 = arith.constant 0 : i32
    return %arg0, %c0_i32 : i32, i32
  }
}

</mosaic_0001>

<bundles_post_ra>
// kernel: dummy_forward.1
= control target key start
LH: loop header
LB: loop body
LE: loop exit
PB: predicated region body
PF: predicated region fallthrough
CT: control target
= control target key end

     0   :  { %s38_s0 = inlined_call_operand.vmem [shape: f32[1,2048], index: 0, kind: input, shape index: {}, may-alias: {0,1}]   ;;  %s39_s1 = inlined_call_operand.vmem [shape: f32[1,2048], index: 1, kind: output, shape index: {}, may-alias: {0,1}]  }
   0x1   :  { %v8_v0 = vld [vmem:[%s38_s0] sm:$0xff]  ;;  %v9_v1 = vld [vmem:[%s38_s0 + $0x8] sm:$0xff] }
   0x2   :  { %10 = vst [vmem:[%s39_s1] sm:$0xff] %v8_v0 }
   0x3   :  { %11 = vst [vmem:[%s39_s1 + $0x8] sm:$0xff] %v9_v1 }

</bundles_post_ra>
